<compile_context>
chip_gen: v7x
topology: tpu7x:2x2x1
jax: 0.10.0
libtpu: 0.0.40
codegen_flags: <defaults>
</compile_context>

<pallas_src>
import functools

import jax
import jax.numpy as jnp
from jax.experimental import pallas as pl
from jax.experimental.pallas import tpu as pltpu


def _outconv_kernel(x_ref, w_ref, b_ref, o_ref, *, nb):
    # x_ref: (nb, C_in, T)   w_ref: (C_out, C_in)   b_ref: (C_out, 1)
    # o_ref: (nb, C_out, T)  -- T lane-dense (multiple of 128 or full H*W)
    w = w_ref[...]
    bias = b_ref[...]
    # nb is small and static -> fully unrolled; each iteration is one MXU
    # matmul with f32 accumulation plus a per-sublane bias add on the VPU.
    # (A masked/OOB batch row just computes garbage that the masked store drops.)
    for i in range(nb):
        acc = jnp.dot(w, x_ref[i], preferred_element_type=jnp.float32)
        o_ref[i] = (acc + bias).astype(o_ref.dtype)


def outconv_1x1(x_nchw, weight, bias, *, target_step_bytes=2 << 20):
    """1x1 conv (PyTorch nn.Conv2d(kernel_size=1)) via Pallas channel matmul.

    x_nchw: (N, C_in, H, W)
    weight: (C_out, C_in)   (PyTorch conv weight squeezed over the 1x1 dims)
    bias:   (C_out,)
    returns (N, C_out, H, W)
    """
    N, C_in, H, W = x_nchw.shape
    C_out = weight.shape[0]
    HW = H * W
    dtype = x_nchw.dtype
    itemsize = jnp.dtype(dtype).itemsize

    # ---- generation-aware VMEM budget -------------------------------------
    try:
        vmem_cap = int(pltpu.get_tpu_info().vmem_capacity_bytes)
    except Exception:  # pragma: no cover - conservative fallback (v7x-sized)
        vmem_cap = 64 << 20
    vmem_budget = int(vmem_cap * 0.55)  # ~36 MiB on v7x (64 MiB), ~70 MiB on v5e/v6e

    # ---- tile selection by per-step bytes ----------------------------------
    per_col = (C_in + C_out) * itemsize              # x read + out write per column
    fixed = 2 * (C_in * C_out + C_out) * itemsize    # weight + bias, double-buffered
    avail = max(vmem_budget - fixed, 4 << 20)
    max_cols = max(128, avail // (2 * per_col))      # double-buffered x/out tiles
    target_cols = max(128, target_step_bytes // per_col)
    step_cols = int(min(target_cols, max_cols))

    if HW <= step_cols:
        # Whole spatial map per block; batch-block to keep DMA steps chunky.
        tile = HW                                    # full array dim -> legal block
        num_tiles = 1
        nb = int(max(1, min(N, step_cols // max(HW, 1), 16)))
    else:
        nb = 1
        tile = max(128, (min(step_cols, HW) // 128) * 128)  # lane-dense tile
        num_tiles = pl.cdiv(HW, tile)                # ragged tail masked by Pallas
    n_batch_blocks = pl.cdiv(N, nb)
    # (v7x note: both grid axes are "parallel", so the 2 TensorCores split the
    #  n_batch_blocks * num_tiles grid; no further balancing done here.)

    # Free reshape: NCHW and (N, C_in, H*W) share the same memory layout.
    x_flat = x_nchw.reshape(N, C_in, HW)
    b2 = bias.reshape(C_out, 1)  # per-sublane constant, broadcast along lanes

    # Explicit VMEM limit with headroom, never above the per-generation budget.
    working = fixed + 2 * nb * tile * per_col
    vmem_limit = int(min(vmem_budget, max(16 << 20, 2 * working)))

    kernel = functools.partial(_outconv_kernel, nb=nb)

    out_flat = pl.pallas_call(
        kernel,
        out_shape=jax.ShapeDtypeStruct((N, C_out, HW), dtype),
        grid_spec=pltpu.PrefetchScalarGridSpec(
            num_scalar_prefetch=0,
            grid=(n_batch_blocks, num_tiles),
            in_specs=[
                pl.BlockSpec((nb, C_in, tile), lambda b, j: (b, 0, j)),
                pl.BlockSpec((C_out, C_in), lambda b, j: (0, 0)),
                pl.BlockSpec((C_out, 1), lambda b, j: (0, 0)),
            ],
            out_specs=pl.BlockSpec((nb, C_out, tile), lambda b, j: (b, 0, j)),
        ),
        compiler_params=pltpu.CompilerParams(
            dimension_semantics=("parallel", "parallel"),
            vmem_limit_bytes=vmem_limit,
        ),
    )(x_flat, weight, b2)

    # Free reshape back to NCHW (no pad was added, so no slice is needed).
    return out_flat.reshape(N, C_out, H, W)


if __name__ == "__main__":
    key = jax.random.PRNGKey(0)
    k_x, k_w, k_b = jax.random.split(key, 3)

    N, C_in, C_out, Hs, Ws = 2, 4, 3, 16, 16

    x = jax.random.normal(k_x, (N, C_in, Hs, Ws), dtype=jnp.float32)
    # Deterministic param init (PyTorch Conv2d default is kaiming-uniform; any
    # deterministic init is fine for this synthetic check).
    bound = 1.0 / jnp.sqrt(C_in)
    weight = jax.random.uniform(k_w, (C_out, C_in), minval=-bound, maxval=bound,
                                dtype=jnp.float32)
    bias = jax.random.uniform(k_b, (C_out,), minval=-bound, maxval=bound,
                              dtype=jnp.float32)

    out = outconv_1x1(x, weight, bias)
    out = jax.block_until_ready(out)

    # Reference check against plain-JAX 1x1 conv semantics (== PyTorch Conv2d).
    ref = jnp.einsum("nchw,oc->nohw", x, weight) + bias[None, :, None, None]
    assert out.shape == (N, C_out, Hs, Ws)
    assert jnp.allclose(out, ref, atol=1e-5, rtol=1e-5)

    print("KERNEL_OK")
</pallas_src>

<mosaic_0001>
module attributes {stable_mosaic.version = 11 : i64} {
  func.func @_outconv_kernel(%arg0: i32, %arg1: i32, %arg2: memref<2x4x256xf32, #tpu.memory_space<vmem>>, %arg3: memref<3x4xf32, #tpu.memory_space<vmem>>, %arg4: memref<3x1xf32, #tpu.memory_space<vmem>>, %arg5: memref<2x3x256xf32, #tpu.memory_space<vmem>>) attributes {dimension_semantics = [#tpu.dimension_semantics<parallel>, #tpu.dimension_semantics<parallel>], iteration_bounds = array<i64: 1, 1>, scalar_prefetch = 0 : i64, scratch_operands = 0 : i64, tpu.core_type = #tpu.core_type<tc>, window_params = [{transform_indices = @transform_0, window_bounds = array<i64: 2, 4, 256>}, {pipeline_mode = #tpu.pipeline_mode<synchronous>, transform_indices = @transform_1, window_bounds = array<i64: 3, 4>}, {pipeline_mode = #tpu.pipeline_mode<synchronous>, transform_indices = @transform_2, window_bounds = array<i64: 3, 1>}, {transform_indices = @transform_3, window_bounds = array<i64: 2, 3, 256>}]} {
    %c0 = arith.constant 0 : index
    %c0_0 = arith.constant 0 : index
    %0 = vector.load %arg3[%c0, %c0_0] : memref<3x4xf32, #tpu.memory_space<vmem>>, vector<3x4xf32>
    %c0_1 = arith.constant 0 : index
    %c0_2 = arith.constant 0 : index
    %1 = vector.load %arg4[%c0_1, %c0_2] : memref<3x1xf32, #tpu.memory_space<vmem>>, vector<3x1xf32>
    %c0_3 = arith.constant 0 : index
    %c0_4 = arith.constant 0 : index
    %c0_5 = arith.constant 0 : index
    %2 = vector.load %arg2[%c0_3, %c0_4, %c0_5] : memref<2x4x256xf32, #tpu.memory_space<vmem>>, vector<1x4x256xf32>
    %3 = vector.shape_cast %2 : vector<1x4x256xf32> to vector<4x256xf32>
    %cst = arith.constant dense<0.000000e+00> : vector<3x256xf32>
    %4 = tpu.matmul %0, %3, %cst {dimension_numbers = #tpu.dot_dimension_numbers<[1], [0], [0], [1], [0, 0, 1, 1], [], []>} : vector<3x4xf32>, vector<4x256xf32>, vector<3x256xf32> -> vector<3x256xf32>
    %5 = vector.broadcast %1 : vector<3x1xf32> to vector<3x256xf32>
    %6 = arith.addf %4, %5 : vector<3x256xf32>
    %c0_6 = arith.constant 0 : index
    %c0_7 = arith.constant 0 : index
    %c0_8 = arith.constant 0 : index
    %7 = vector.load %arg5[%c0_6, %c0_7, %c0_8] : memref<2x3x256xf32, #tpu.memory_space<vmem>>, vector<1x3x256xf32>
    %8 = vector.shape_cast %7 : vector<1x3x256xf32> to vector<3x256xf32>
    %9 = vector.shape_cast %6 : vector<3x256xf32> to vector<1x3x256xf32>
    tpu.vector_store %arg5[%c0_6, %c0_7, %c0_8], %9 {strides = array<i32>} : memref<2x3x256xf32, #tpu.memory_space<vmem>>, vector<1x3x256xf32>,
    %c1 = arith.constant 1 : index
    %c0_9 = arith.constant 0 : index
    %c0_10 = arith.constant 0 : index
    %10 = vector.load %arg2[%c1, %c0_9, %c0_10] : memref<2x4x256xf32, #tpu.memory_space<vmem>>, vector<1x4x256xf32>
    %11 = vector.shape_cast %10 : vector<1x4x256xf32> to vector<4x256xf32>
    %cst_11 = arith.constant dense<0.000000e+00> : vector<3x256xf32>
    %12 = tpu.matmul %0, %11, %cst_11 {dimension_numbers = #tpu.dot_dimension_numbers<[1], [0], [0], [1], [0, 0, 1, 1], [], []>} : vector<3x4xf32>, vector<4x256xf32>, vector<3x256xf32> -> vector<3x256xf32>
    %13 = vector.broadcast %1 : vector<3x1xf32> to vector<3x256xf32>
    %14 = arith.addf %12, %13 : vector<3x256xf32>
    %c1_12 = arith.constant 1 : index
    %c0_13 = arith.constant 0 : index
    %c0_14 = arith.constant 0 : index
    %15 = vector.load %arg5[%c1_12, %c0_13, %c0_14] : memref<2x3x256xf32, #tpu.memory_space<vmem>>, vector<1x3x256xf32>
    %16 = vector.shape_cast %15 : vector<1x3x256xf32> to vector<3x256xf32>
    %17 = vector.shape_cast %14 : vector<3x256xf32> to vector<1x3x256xf32>
    tpu.vector_store %arg5[%c1_12, %c0_13, %c0_14], %17 {strides = array<i32>} : memref<2x3x256xf32, #tpu.memory_space<vmem>>, vector<1x3x256xf32>,
    return
  }
  func.func @transform_0(%arg0: i32, %arg1: i32) -> (i32, i32, i32) {
    %c0_i32 = arith.constant 0 : i32
    %c0_i32_0 = arith.constant 0 : i32
    return %arg0, %c0_i32, %arg1 : i32, i32, i32
  }
  func.func @transform_1(%arg0: i32, %arg1: i32) -> (i32, i32) {
    %c0_i32 = arith.constant 0 : i32
    %c0_i32_0 = arith.constant 0 : i32
    %c0_i32_1 = arith.constant 0 : i32
    return %c0_i32, %c0_i32_0 : i32, i32
  }
  func.func @transform_2(%arg0: i32, %arg1: i32) -> (i32, i32) {
    %c0_i32 = arith.constant 0 : i32
    %c0_i32_0 = arith.constant 0 : i32
    %c0_i32_1 = arith.constant 0 : i32
    return %c0_i32, %c0_i32_0 : i32, i32
  }
  func.func @transform_3(%arg0: i32, %arg1: i32) -> (i32, i32, i32) {
    %c0_i32 = arith.constant 0 : i32
    %c0_i32_0 = arith.constant 0 : i32
    return %arg0, %c0_i32, %arg1 : i32, i32, i32
  }
}

</mosaic_0001>

<bundles_post_ra>
// kernel: tpu_custom_call.1
= control target key start
LH: loop header
LB: loop body
LE: loop exit
PB: predicated region body
PF: predicated region fallthrough
CT: control target
= control target key end

     0   :  { %8 = vsyncpa [#allocation3], 0  ;;  %s252_s12 = smov [#allocation2]   ;;  %s301_s0 = inlined_call_operand.hbm [shape: f32[2,4,256], index: 0, kind: input, shape index: {}]   ;;  %s302_s1 = inlined_call_operand.vmem [shape: f32[3,4], index: 1, kind: input, shape index: {}]   ;;  %s303_s2 = inlined_call_operand.vmem [shape: f32[3,1], index: 2, kind: input, shape index: {}]   ;;  %s304_s3 = inlined_call_operand.vmem [shape: f32[2,3,256], index: 3, kind: output, shape index: {}]  }
   0x1   :  { %s14_s13 = sshll.u32 %s252_s12, 4  ;;  %s228_s16 = scalar_lea.hbm %s301_s0, 256  ;;  %s15_s13 = int_to_ptr.vmem [resolvable:$true] %s14_s13 }
   0x2   :  { %p229_p0 = scmp.ne.s32.totalorder %s301_s0, %s228_s16  ;;  %p232_p1 = scmp.lt.u32.totalorder %s228_s16, %s301_s0 }
   0x4   :  { %p234_p2 = pnand %p232_p1, %p229_p0 }
   0x6   :  { %237 = shalt.err (!%p234_p2)
}
   0x7   :  { %s238_s21 = scalar_lea.vmem %s15_s13, 256  ;;  %p243_p4 = scmp.lt.s32.totalorder %s15_s13, %s15_s13 }
   0x8   :  { %p239_p3 = scmp.ne.s32.totalorder %s15_s13, %s238_s21  ;;  %p244_p5 = scmp.lt.s32.totalorder %s238_s21, %s238_s21 }
   0xa   :  { %p245_p6 = por %p244_p5, %p243_p4 }
   0xc   :  { %p246_p7 = pnand %p245_p6, %p239_p3 }
   0xe   :  { %249 = shalt.err (!%p246_p7)
}
   0xf   :  { %s253_s22 = smov 128   ;;  %s254_s23 = smov 8  }
  0x10   :  { %20 = dma.hbm_to_vmem [thread:$0]  %s301_s0, 256, %s15_s13, [#allocation3], %s253_s22, %s253_s22, %s254_s23  }
  0x11   :  { %250 = dma.done.wait [#allocation3], 256  }
  0x12   :  { %251 = vsyncadd [#allocation3], 4294967040  ;;  %v255_v0 = vmov 0.0   ;;  %v256_v1 = vmov 0   ;;  %v30_v2 = vld [vmem:[#allocation2] sm:$0xff]  ;;  %vm42_vm0 = vcmask 1043456  }
  0x13   :  { %111 = vmatprep.mubr.f32.mxu0 %v255_v0  ;;  %195 = vmatprep.mubr.f32.mxu1 %v255_v0  ;;  %v124_v3 = vld [vmem:[#allocation2 + $0x8] sm:$0xff]  ;;  %v37_v4 = vcombine.high %v30_v2, %v30_v2  ;;  %v29_v6 = vld [vmem:[%s303_s2] sm:$0x7]  ;;  %vm38_vm1 = vcmask 31744  }
  0x14   :  { %225 = vset.pattern.permute.xlu0 %v256_v1  ;;  %v126_v5 = vcombine.high %v124_v3, %v124_v3  ;;  %v28_v7 = vld [vmem:[%s302_s1] sm:$0x7] }
  0x15   :  { %33 = vperm.xlu0 %225, %v29_v6   ;;  %213 = vmatprep.subr.msk.mxu0 %vm42_vm0, %v37_v4 }
  0x16   :  { %216 = vmatprep.subr.msk.mxu1 %vm42_vm0, %v126_v5  ;;  %214 = vmatpush1.msk.msra.mxu0 %vm42_vm0, %v30_v2 }
  0x17   :  { %217 = vmatpush1.msk.msra.mxu1 %vm42_vm0, %v124_v3  ;;  %215 = vmatmul.mubr.msk.f32.vlgmr.msra.gmra.mrb[0].mxu0 %vm38_vm1, %v28_v7 }
  0x18   :  { %218 = vmatmul.mubr.msk.f32.vlgmr.msra.gmra.mrb[0].mxu1 %vm38_vm1, %v28_v7 }
  0x94   :  { %v34_v8 = vpop.permute.xlu0 %33 }
  0xea   :  { %v113_v9 = vpop.f32.mrb[0].mxu0 }
  0xeb   :  { %v197_v10 = vpop.f32.mrb[0].mxu1  ;;  %v114_v11 = vadd.f32 %v113_v9, %v34_v8  ;;  %v115_v13 = vpop.f32.mrb[1].mxu0 }
  0xec   :  { %v198_v12 = vadd.f32 %v197_v10, %v34_v8  ;;  %v199_v14 = vpop.f32.mrb[1].mxu1  ;;  %v116_v15 = vadd.f32 %v115_v13, %v34_v8 }
  0xed   :  { %v200_v16 = vadd.f32 %v199_v14, %v34_v8 }
  0xee   :  { %v120_v17 = vcombine.low %v114_v11, %v116_v15 }
  0xef   :  { %v204_v18 = vcombine.low %v198_v12, %v200_v16 }
  0xf0   :  { %122 = vst [vmem:[%s304_s3] sm:$0x77] %v120_v17 }
  0xf1   :  { %219 = vst [vmem:[%s304_s3 + $0x8] sm:$0x77] %v204_v18 }
  0xf2   :  { %212 = vsyncpa [#allocation3], 1 }

</bundles_post_ra>
